<compile_context>
chip_gen: v7x
topology: tpu7x:2x2x1
jax: 0.10.0
libtpu: 0.0.40
codegen_flags: <defaults>
</compile_context>

<pallas_src>
import functools

import jax
import jax.numpy as jnp
from jax import lax
from jax.experimental import pallas as pl
from jax.experimental.pallas import tpu as pltpu


def _round_up(x: int, m: int) -> int:
    return (x + m - 1) // m * m


def _msecross_kernel(xt_ref, yt_ref, out_ref, *, n_cols: int):
    """One column-tile (tile of samples) of the fused loss, transposed layout.

    xt_ref : (C, T)  logits tile:   sublanes 0..4 = BCE logits, sublanes 5.. = CE logits
    yt_ref : (6, T)  targets tile:  sublanes 0..4 = BCE targets, sublane 5 = class id
    out_ref: (8, 128) per-tile partials: [0,0] = sum of BCE elements,
                                         [1,0] = sum of CE per-sample losses.
    """
    i = pl.program_id(0)

    x = xt_ref[...].astype(jnp.float32)      # (C, T)
    yv = yt_ref[...].astype(jnp.float32)     # (6, T)
    C, T = x.shape

    # Ragged last tile: columns >= n_cols are undefined garbage -> select-mask.
    col_ids = i * T + lax.broadcasted_iota(jnp.int32, (1, T), 1)   # (1, T)
    valid = col_ids < n_cols                                       # (1, T) bool

    # ---- BCEWithLogitsLoss over sublanes [0, 5) ----
    xb = x[:5, :]
    tb = yv[:5, :]
    bce = jnp.maximum(xb, 0.0) - xb * tb + jnp.log1p(jnp.exp(-jnp.abs(xb)))
    bce = jnp.where(valid, bce, 0.0)          # select, not multiply: NaN/Inf-safe
    bce_s = jnp.sum(bce)

    # ---- CrossEntropyLoss over sublanes [5, C), label = yv[5] ----
    row = lax.broadcasted_iota(jnp.int32, (C, T), 0)               # (C, T)
    neg = jnp.float32(-1e30)
    logits_m = jnp.where(row >= 5, x, neg)                         # non-CE rows -> -big
    m = jnp.max(logits_m, axis=0, keepdims=True)                   # (1, T)
    esum = jnp.sum(jnp.exp(logits_m - m), axis=0, keepdims=True)   # masked rows -> 0
    lse = m + jnp.log(esum)                                        # (1, T)
    # Labels arrive as float (torch .long() semantics on a float tensor); exact
    # for class counts < 2^24.
    lab = yv[5:6, :].astype(jnp.int32)                             # (1, T)
    tgt = jnp.sum(jnp.where(row == lab + 5, x, 0.0), axis=0, keepdims=True)
    ce = jnp.where(valid, lse - tgt, 0.0)
    ce_s = jnp.sum(ce)

    # Per-tile partial sums; lane-dense (8,128) block, only [0,0]/[1,0] non-zero.
    r8 = lax.broadcasted_iota(jnp.int32, (8, 128), 0)
    l8 = lax.broadcasted_iota(jnp.int32, (8, 128), 1)
    out_ref[...] = jnp.where((r8 == 0) & (l8 == 0), bce_s,
                             jnp.where((r8 == 1) & (l8 == 0), ce_s, 0.0))


def msecross(yhat: jax.Array, y: jax.Array, *, tile_cols: int = 16384) -> jax.Array:
    """yhat: (N, 5+K) logits; y: (N, >=6) with y[:, :5] BCE targets and y[:, 5]
    an integer-valued class label (torch .long() semantics)."""
    N, C = yhat.shape
    Wy = y.shape[1]
    assert C > 5 and Wy >= 6
    K = C - 5

    # Lane-dense presentation: batch on the lane axis (layout plumbing, per review).
    xt = yhat.T            # (C, N)
    yt = y[:, :6].T        # (6, N)

    # Column (sample) tile: multiple of 128 lanes, capped so double-buffered
    # blocks + f32 temporaries stay comfortably inside v7x's 64 MiB VMEM.
    if N < 128:
        t = N
    else:
        t = min(_round_up(tile_cols, 128), (N // 128) * 128, 64 * 1024)
    grid_n = pl.cdiv(N, t)

    itemsize = jnp.dtype(yhat.dtype).itemsize
    cost = pl.CostEstimate(
        flops=int(N * (C + 6) * 8),
        transcendentals=int(N * (K + 7)),
        bytes_accessed=int(N * C * itemsize + N * 6 * jnp.dtype(y.dtype).itemsize
                           + grid_n * 8 * 128 * 4),
    )

    partials = pl.pallas_call(
        functools.partial(_msecross_kernel, n_cols=N),
        out_shape=jax.ShapeDtypeStruct((8, grid_n * 128), jnp.float32),
        grid_spec=pltpu.PrefetchScalarGridSpec(
            num_scalar_prefetch=0,
            grid=(grid_n,),
            in_specs=[
                pl.BlockSpec((C, t), lambda i: (0, i)),
                pl.BlockSpec((6, t), lambda i: (0, i)),
            ],
            out_specs=pl.BlockSpec((8, 128), lambda i: (0, i)),
        ),
        compiler_params=pltpu.CompilerParams(
            # No cross-step dependency -> "parallel": v7x shards the loop
            # across both TensorCores; no effect (and no cost) on v5e/v6e.
            dimension_semantics=("parallel",),
            vmem_limit_bytes=32 * 1024 * 1024,
        ),
        cost_estimate=cost,
    )(xt, yt)

    # Tiny final reduction of per-tile partials (better f32 accuracy than a
    # single serial scalar accumulator).
    bce_total = jnp.sum(partials[0, :])
    ce_total = jnp.sum(partials[1, :])
    return 2.0 * bce_total / (5.0 * N) + ce_total / N


def _msecross_ref(yhat, y):
    # pure-JAX reference mirroring the PyTorch module
    x = yhat[:, :5].astype(jnp.float32)
    t = y[:, :5].astype(jnp.float32)
    bce = jnp.mean(jnp.maximum(x, 0.0) - x * t + jnp.log1p(jnp.exp(-jnp.abs(x))))
    logits = yhat[:, 5:].astype(jnp.float32)
    labels = y[:, 5].astype(jnp.int32)
    lse = jax.scipy.special.logsumexp(logits, axis=-1)
    tgt = jnp.take_along_axis(logits, labels[:, None], axis=-1)[:, 0]
    ce = jnp.mean(lse - tgt)
    return 2.0 * bce + ce


if __name__ == "__main__":
    key = jax.random.PRNGKey(0)

    # --- primary test: N=8 rows, K=8 CE classes (single tile, N < 128 path) ---
    N, K = 8, 8
    k1, k2, k3 = jax.random.split(key, 3)
    yhat = jax.random.normal(k1, (N, 5 + K), dtype=jnp.float32)
    bce_targets = jax.random.uniform(k2, (N, 5), dtype=jnp.float32)
    class_labels = jax.random.randint(k3, (N,), 0, K).astype(jnp.float32)
    y = jnp.concatenate([bce_targets, class_labels[:, None]], axis=1)  # (N, 6)

    out = msecross(yhat, y)
    jax.block_until_ready(out)
    ref = _msecross_ref(yhat, y)
    assert jnp.allclose(out, ref, rtol=1e-5, atol=1e-5), (out, ref)

    # --- multi-tile grid with a ragged (masked) last tile ---
    N2, K2 = 300, 11
    k4, k5, k6 = jax.random.split(jax.random.PRNGKey(1), 3)
    yhat2 = jax.random.normal(k4, (N2, 5 + K2), dtype=jnp.float32)
    t2 = jax.random.uniform(k5, (N2, 5), dtype=jnp.float32)
    lab2 = jax.random.randint(k6, (N2,), 0, K2).astype(jnp.float32)
    y2 = jnp.concatenate([t2, lab2[:, None]], axis=1)

    out2 = msecross(yhat2, y2, tile_cols=128)
    jax.block_until_ready(out2)
    ref2 = _msecross_ref(yhat2, y2)
    assert jnp.allclose(out2, ref2, rtol=1e-5, atol=1e-5), (out2, ref2)

    # --- default-tile path: N not a multiple of 128, nearly-empty last tile ---
    N3, K3 = 4100, 16
    k7, k8, k9 = jax.random.split(jax.random.PRNGKey(2), 3)
    yhat3 = jax.random.normal(k7, (N3, 5 + K3), dtype=jnp.float32)
    t3 = jax.random.uniform(k8, (N3, 5), dtype=jnp.float32)
    lab3 = jax.random.randint(k9, (N3,), 0, K3).astype(jnp.float32)
    y3 = jnp.concatenate([t3, lab3[:, None]], axis=1)

    out3 = msecross(yhat3, y3)
    jax.block_until_ready(out3)
    ref3 = _msecross_ref(yhat3, y3)
    assert jnp.allclose(out3, ref3, rtol=1e-4, atol=1e-4), (out3, ref3)

    print("KERNEL_OK")
</pallas_src>

<mosaic_0001>
module attributes {stable_mosaic.version = 11 : i64} {
  func.func @_msecross_kernel(%arg0: i32, %arg1: memref<13x8xf32, #tpu.memory_space<vmem>>, %arg2: memref<6x8xf32, #tpu.memory_space<vmem>>, %arg3: memref<8x128xf32, #tpu.memory_space<vmem>>) attributes {dimension_semantics = [#tpu.dimension_semantics<parallel>], iteration_bounds = array<i64: 1>, scalar_prefetch = 0 : i64, scratch_operands = 0 : i64, tpu.core_type = #tpu.core_type<tc>, window_params = [{transform_indices = @transform_0, window_bounds = array<i64: 13, 8>}, {transform_indices = @transform_1, window_bounds = array<i64: 6, 8>}, {transform_indices = @transform_2, window_bounds = array<i64: 8, 128>}]} {
    %c0 = arith.constant 0 : index
    %c0_0 = arith.constant 0 : index
    %0 = vector.load %arg1[%c0, %c0_0] : memref<13x8xf32, #tpu.memory_space<vmem>>, vector<13x8xf32>
    %c0_1 = arith.constant 0 : index
    %c0_2 = arith.constant 0 : index
    %1 = vector.load %arg2[%c0_1, %c0_2] : memref<6x8xf32, #tpu.memory_space<vmem>>, vector<6x8xf32>
    %c8_i32 = arith.constant 8 : i32
    %2 = arith.muli %arg0, %c8_i32 : i32
    %3 = tpu.iota {dimensions = array<i32: 1>} : vector<1x8xi32>
    %4 = vector.broadcast %2 : i32 to vector<1x8xi32>
    %5 = arith.addi %4, %3 : vector<1x8xi32>
    %c8_i32_3 = arith.constant 8 : i32
    %6 = vector.broadcast %c8_i32_3 : i32 to vector<1x8xi32>
    %7 = arith.cmpi slt, %5, %6 : vector<1x8xi32>
    %8 = vector.extract_strided_slice %0 {offsets = [0, 0], sizes = [5, 8], strides = [1, 1]} : vector<13x8xf32> to vector<5x8xf32>
    %9 = vector.extract_strided_slice %1 {offsets = [0, 0], sizes = [5, 8], strides = [1, 1]} : vector<6x8xf32> to vector<5x8xf32>
    %cst = arith.constant 0.000000e+00 : f32
    %10 = vector.broadcast %cst : f32 to vector<5x8xf32>
    %11 = arith.maximumf %8, %10 : vector<5x8xf32>
    %12 = arith.mulf %8, %9 : vector<5x8xf32>
    %13 = arith.subf %11, %12 : vector<5x8xf32>
    %14 = math.absf %8 : vector<5x8xf32>
    %cst_4 = arith.constant 0.000000e+00 : f32
    %15 = vector.broadcast %cst_4 : f32 to vector<5x8xf32>
    %16 = arith.subf %15, %14 : vector<5x8xf32>
    %17 = math.exp %16 : vector<5x8xf32>
    %18 = math.log1p %17 : vector<5x8xf32>
    %19 = arith.addf %13, %18 : vector<5x8xf32>
    %cst_5 = arith.constant 0.000000e+00 : f32
    %20 = vector.shape_cast %7 : vector<1x8xi1> to vector<1x8xi1>
    %21 = vector.broadcast %20 : vector<1x8xi1> to vector<5x8xi1>
    %22 = vector.broadcast %cst_5 : f32 to vector<5x8xf32>
    %23 = arith.select %21, %19, %22 : vector<5x8xi1>, vector<5x8xf32>
    %24 = vector.shape_cast %23 : vector<5x8xf32> to vector<1x5x8xf32>
    %cst_6 = arith.constant dense<0.000000e+00> : vector<1xf32>
    %25 = vector.multi_reduction <add>, %24, %cst_6 [1, 2] : vector<1x5x8xf32> to vector<1xf32>
    %26 = vector.shape_cast %25 : vector<1xf32> to vector<1x1x1xf32>
    %27 = vector.extract %26[0, 0, 0] : f32 from vector<1x1x1xf32>
    %28 = tpu.iota {dimensions = array<i32: 0>} : vector<13x8xi32>
    %c5_i32 = arith.constant 5 : i32
    %29 = vector.broadcast %c5_i32 : i32 to vector<13x8xi32>
    %30 = arith.cmpi sge, %28, %29 : vector<13x8xi32>
    %cst_7 = arith.constant -1.000000e+30 : f32
    %31 = vector.broadcast %cst_7 : f32 to vector<13x8xf32>
    %32 = arith.select %30, %0, %31 : vector<13x8xi1>, vector<13x8xf32>
    %cst_8 = arith.constant dense<0xFF800000> : vector<8xf32>
    %33 = vector.multi_reduction <maximumf>, %32, %cst_8 [0] : vector<13x8xf32> to vector<8xf32>
    %34 = vector.shape_cast %33 : vector<8xf32> to vector<1x8xf32>
    %35 = vector.broadcast %34 : vector<1x8xf32> to vector<13x8xf32>
    %36 = arith.subf %32, %35 : vector<13x8xf32>
    %37 = math.exp %36 : vector<13x8xf32>
    %cst_9 = arith.constant dense<0.000000e+00> : vector<8xf32>
    %38 = vector.multi_reduction <add>, %37, %cst_9 [0] : vector<13x8xf32> to vector<8xf32>
    %39 = vector.shape_cast %38 : vector<8xf32> to vector<1x8xf32>
    %40 = math.log %39 : vector<1x8xf32>
    %41 = arith.addf %34, %40 : vector<1x8xf32>
    %42 = vector.extract_strided_slice %1 {offsets = [5, 0], sizes = [1, 8], strides = [1, 1]} : vector<6x8xf32> to vector<1x8xf32>
    %43 = arith.fptosi %42 : vector<1x8xf32> to vector<1x8xi32>
    %c5_i32_10 = arith.constant 5 : i32
    %44 = vector.broadcast %c5_i32_10 : i32 to vector<1x8xi32>
    %45 = arith.addi %43, %44 : vector<1x8xi32>
    %46 = vector.broadcast %45 : vector<1x8xi32> to vector<13x8xi32>
    %47 = arith.cmpi eq, %28, %46 : vector<13x8xi32>
    %cst_11 = arith.constant 0.000000e+00 : f32
    %48 = vector.broadcast %cst_11 : f32 to vector<13x8xf32>
    %49 = arith.select %47, %0, %48 : vector<13x8xi1>, vector<13x8xf32>
    %cst_12 = arith.constant dense<0.000000e+00> : vector<8xf32>
    %50 = vector.multi_reduction <add>, %49, %cst_12 [0] : vector<13x8xf32> to vector<8xf32>
    %51 = vector.shape_cast %50 : vector<8xf32> to vector<1x8xf32>
    %52 = arith.subf %41, %51 : vector<1x8xf32>
    %cst_13 = arith.constant 0.000000e+00 : f32
    %53 = vector.broadcast %cst_13 : f32 to vector<1x8xf32>
    %54 = arith.select %7, %52, %53 : vector<1x8xi1>, vector<1x8xf32>
    %55 = vector.shape_cast %54 : vector<1x8xf32> to vector<1x1x8xf32>
    %cst_14 = arith.constant dense<0.000000e+00> : vector<1xf32>
    %56 = vector.multi_reduction <add>, %55, %cst_14 [1, 2] : vector<1x1x8xf32> to vector<1xf32>
    %57 = vector.shape_cast %56 : vector<1xf32> to vector<1x1x1xf32>
    %58 = vector.extract %57[0, 0, 0] : f32 from vector<1x1x1xf32>
    %59 = tpu.iota {dimensions = array<i32: 0>} : vector<8x128xi32>
    %60 = tpu.iota {dimensions = array<i32: 1>} : vector<8x128xi32>
    %c0_i32 = arith.constant 0 : i32
    %61 = vector.broadcast %c0_i32 : i32 to vector<8x128xi32>
    %62 = arith.cmpi eq, %59, %61 : vector<8x128xi32>
    %c0_i32_15 = arith.constant 0 : i32
    %63 = vector.broadcast %c0_i32_15 : i32 to vector<8x128xi32>
    %64 = arith.cmpi eq, %60, %63 : vector<8x128xi32>
    %65 = arith.andi %62, %64 : vector<8x128xi1>
    %c1_i32 = arith.constant 1 : i32
    %66 = vector.broadcast %c1_i32 : i32 to vector<8x128xi32>
    %67 = arith.cmpi eq, %59, %66 : vector<8x128xi32>
    %c0_i32_16 = arith.constant 0 : i32
    %68 = vector.broadcast %c0_i32_16 : i32 to vector<8x128xi32>
    %69 = arith.cmpi eq, %60, %68 : vector<8x128xi32>
    %70 = arith.andi %67, %69 : vector<8x128xi1>
    %cst_17 = arith.constant 0.000000e+00 : f32
    %71 = vector.broadcast %58 : f32 to vector<8x128xf32>
    %72 = vector.broadcast %cst_17 : f32 to vector<8x128xf32>
    %73 = arith.select %70, %71, %72 : vector<8x128xi1>, vector<8x128xf32>
    %74 = vector.broadcast %27 : f32 to vector<8x128xf32>
    %75 = arith.select %65, %74, %73 : vector<8x128xi1>, vector<8x128xf32>
    %c0_18 = arith.constant 0 : index
    %c0_19 = arith.constant 0 : index
    %76 = vector.load %arg3[%c0_18, %c0_19] : memref<8x128xf32, #tpu.memory_space<vmem>>, vector<8x128xf32>
    tpu.vector_store %arg3[%c0_18, %c0_19], %75 {strides = array<i32>} : memref<8x128xf32, #tpu.memory_space<vmem>>, vector<8x128xf32>,
    return
  }
  func.func @transform_0(%arg0: i32) -> (i32, i32) {
    %c0_i32 = arith.constant 0 : i32
    %c0_i32_0 = arith.constant 0 : i32
    return %c0_i32, %arg0 : i32, i32
  }
  func.func @transform_1(%arg0: i32) -> (i32, i32) {
    %c0_i32 = arith.constant 0 : i32
    %c0_i32_0 = arith.constant 0 : i32
    return %c0_i32, %arg0 : i32, i32
  }
  func.func @transform_2(%arg0: i32) -> (i32, i32) {
    %c0_i32 = arith.constant 0 : i32
    %c0_i32_0 = arith.constant 0 : i32
    return %c0_i32, %arg0 : i32, i32
  }
}

</mosaic_0001>

<bundles_post_ra>
// kernel: tpu_custom_call.1
= control target key start
LH: loop header
LB: loop body
LE: loop exit
PB: predicated region body
PF: predicated region fallthrough
CT: control target
= control target key end

     0   :  { %v16_v2 = vlaneseq  ;;  %vm41_vm0 = vcmask 61440   ;;  %s244_s0 = inlined_call_operand.vmem [shape: f32[13,8], index: 0, kind: input, shape index: {}]   ;;  %s245_s1 = inlined_call_operand.vmem [shape: f32[6,8], index: 1, kind: input, shape index: {}]   ;;  %s246_s2 = inlined_call_operand.hbm [shape: f32[8,128], index: 2, kind: output, shape index: {}]  }
   0x1   :  { %v12_v0 = vld [vmem:[%s244_s0] sm:$0xff]  ;;  %v13_v1 = vld [vmem:[%s244_s0 + $0x8] sm:$0x1f] }
   0x2   :  { %v24_v3 = vand.u32 2147483647, %v12_v0 }
   0x3   :  { %7 = vsyncpa [#allocation3], 0  ;;  %v206_v4 = vshrl.u32 %v16_v2, 7  ;;  %vm59_vm1 = vcmask 64512   ;;  %v61_v6 = vsel %vm41_vm0, %v13_v1, -inf  ;;  %v21_v29 = vmax.f32 %v12_v0, 0.0 }
   0x4   :  { %v25_v5 = vsub.f32 0.0, %v24_v3  ;;  %v14_v12 = vld [vmem:[%s245_s1] sm:$0x3f]  ;;  %v216_v35 = vand.u32 127, %v16_v2  ;;  %vm108_vm7 = vcmask 57344   ;;  %s184_s14 = smov [#allocation2]  }
   0x5   :  { %vm55_vm2 = vcmp.ge.s32.totalorder %v206_v4, 5  ;;  %v145_v15 = vtrunc.f32 %v14_v12  ;;  %v91_v26 = vsub.s32 5, %v206_v4  ;;  %v22_v30 = vmul.f32 %v14_v12, %v12_v0  ;;  %s135_s15 = sshll.u32 %s184_s14, 4  ;;  %s136_s15 = int_to_ptr.vmem [resolvable:$true] %s135_s15 }
   0x6   :  { %v26_v7 = vmul.f32 1.442695, %v25_v5  ;;  %v57_v8 = vsel %vm55_vm2, %v12_v0, -1e+30  ;;  %v54_v33 = vadd.s32 8, %v206_v4  ;;  %vm20_vm6 = vcmp.lt.s32.totalorder %v216_v35, 8  ;;  %p165_p1 = scmp.lt.s32.totalorder %s136_s15, %s136_s15 }
   0x7   :  { %v60_v9 = vsel %vm59_vm1, %v57_v8, -inf  ;;  %v146_v20 = vcvt.f32.s32 %v145_v15  ;;  %v23_v38 = vsub.f32 %v21_v29, %v22_v30  ;;  %vm120_vm8 = vcmp.eq.s32.totalorder %v216_v35, 0  ;;  %s160_s17 = scalar_lea.vmem %s136_s15, 128 }
   0x8   :  { %150 = vpow2.f32 %v26_v7  ;;  %v62_v10 = vmax.f32 %v60_v9, %v61_v6  ;;  %vm122_vm9 = vcmp.eq.s32.totalorder %v206_v4, 1  ;;  %vm119_vm10 = vcmp.eq.s32.totalorder %v206_v4, 0  ;;  %p161_p0 = scmp.ne.s32.totalorder %s136_s15, %s160_s17  ;;  %p166_p2 = scmp.lt.s32.totalorder %s160_s17, %s160_s17 }
   0x9   :  { %v88_v25 = vadd.s32 5, %v146_v20  ;;  %vm123_vm11 = vmand %vm122_vm9, %vm120_vm8 }
   0xa   :  { %v63_v11 = vrot.slane %v62_v10, 4  ;;  %vm121_vm12 = vmand %vm119_vm10, %vm120_vm8  ;;  %p167_p3 = por %p166_p2, %p165_p1 }
   0xb   :  { %v92_v34 = vrot.slane %v88_v25, %v91_v26 }
   0xc   :  { %v64_v13 = vmax.f32 %v62_v10, %v63_v11  ;;  %p168_p4 = pnand %p167_p3, %p161_p0 }
   0xd   :  { %vm93_vm4 = vcmp.eq.s32.totalorder %v206_v4, %v92_v34  ;;  %vm94_vm5 = vcmp.eq.s32.totalorder %v54_v33, %v92_v34 }
   0xe   :  { %v65_v14 = vrot.slane %v64_v13, 2  ;;  %v95_v41 = vsel %vm93_vm4, %v12_v0, 0.0  ;;  %v96_v42 = vsel %vm94_vm5, %v13_v1, 0.0 }
   0xf   :  { %v97_v48 = vsel %vm59_vm1, %v95_v41, 0.0  ;;  %v98_v49 = vsel %vm41_vm0, %v96_v42, 0.0 }
  0x10   :  { %v66_v16 = vmax.f32 %v64_v13, %v65_v14  ;;  %v99_v53 = vadd.f32 %v98_v49, %v97_v48 }
  0x12   :  { %v151_v17 = vpop.eup %150  ;;  %v67_v18 = vrot.slane %v66_v16, 1  ;;  %v100_v56 = vrot.slane %v99_v53, 4 }
  0x13   :  { %v28_v19 = vadd.f32 1.0, %v151_v17  ;;  %v31_v22 = vmul.f32 -0.5, %v151_v17  ;;  %v34_v32 = vand.u32 2147483647, %v151_v17 }
  0x14   :  { %v68_v21 = vmax.f32 %v66_v16, %v67_v18  ;;  %v101_v59 = vadd.f32 %v100_v56, %v99_v53 }
  0x15   :  { %152 = vlog2.f32 %v28_v19  ;;  %v32_v31 = vadd.f32 1.0, %v31_v22  ;;  %vm35_vm3 = vcmp.lt.f32.partialorder %v34_v32, 0.0004427343 }
  0x16   :  { %v69_v23 = vsub.f32 %v57_v8, %v68_v21  ;;  %v70_v24 = vsub.f32 %v13_v1, %v68_v21  ;;  %v102_v62 = vrot.slane %v101_v59, 2 }
  0x17   :  { %v33_v36 = vmul.f32 %v151_v17, %v32_v31 }
  0x18   :  { %v71_v27 = vmul.f32 1.442695, %v69_v23  ;;  %v73_v28 = vmul.f32 1.442695, %v70_v24  ;;  %v103_v63 = vadd.f32 %v102_v62, %v101_v59 }
  0x1a   :  { %154 = vpow2.f32 %v71_v27  ;;  %v104_v0 = vrot.slane %v103_v63, 1 }
  0x1b   :  { %156 = vpow2.f32 %v73_v28 }
  0x1c   :  { %v105_v3 = vadd.f32 %v104_v0, %v103_v63 }
  0x1f   :  { %v153_v37 = vpop.eup %152 }
  0x20   :  { %v30_v39 = vmul.f32 0.6931472, %v153_v37 }
  0x22   :  { %v36_v40 = vsel %vm35_vm3, %v33_v36, %v30_v39 }
  0x23   :  { %v37_v43 = vadd.f32 %v36_v40, %v23_v38 }
  0x24   :  { %v155_v44 = vpop.eup %154 }
  0x25   :  { %v157_v45 = vpop.eup %156  ;;  %v40_v46 = vsel %vm20_vm6, %v37_v43, 0.0  ;;  %v75_v47 = vsel %vm59_vm1, %v155_v44, 0.0 }
  0x26   :  { %v42_v50 = vsel %vm41_vm0, %v40_v46, 0.0  ;;  %v76_v51 = vsel %vm41_vm0, %v157_v45, 0.0 }
  0x27   :  { %v77_v52 = vadd.f32 %v76_v51, %v75_v47  ;;  %43 = vadd.xlane.f32.xlu0 %v42_v50 }
  0x29   :  { %v78_v54 = vrot.slane %v77_v52, 4 }
  0x2b   :  { %v79_v55 = vadd.f32 %v78_v54, %v77_v52 }
  0x2d   :  { %v80_v57 = vrot.slane %v79_v55, 2 }
  0x2f   :  { %v81_v58 = vadd.f32 %v80_v57, %v79_v55 }
  0x31   :  { %v82_v60 = vrot.slane %v81_v58, 1 }
  0x33   :  { %v83_v61 = vadd.f32 %v82_v60, %v81_v58 }
  0x35   :  { %158 = vlog2.f32 %v83_v61 }
  0x3f   :  { %v159_v1 = vpop.eup %158 }
  0x40   :  { %v85_v2 = vmul.f32 0.6931472, %v159_v1 }
  0x42   :  { %v86_v5 = vadd.f32 %v85_v2, %v68_v21 }
  0x44   :  { %v106_v6 = vsub.f32 %v86_v5, %v105_v3 }
  0x46   :  { %v107_v7 = vsel %vm20_vm6, %v106_v6, 0.0 }
  0x47   :  { %v109_v8 = vsel %vm108_vm7, %v107_v7, 0.0 }
  0x48   :  { %110 = vadd.xlane.f32.xlu0 %v109_v8 }
  0xb4   :  { %v44_v9 = vpop.xlane.xlu0 %43 }
  0xb5   :  { %v45_v10 = vrot.slane %v44_v9, 4 }
  0xb7   :  { %v46_v11 = vadd.f32 %v45_v10, %v44_v9 }
  0xb9   :  { %v47_v12 = vrot.slane %v46_v11, 2 }
  0xbb   :  { %v48_v13 = vadd.f32 %v47_v12, %v46_v11 }
  0xbd   :  { %v49_v14 = vrot.slane %v48_v13, 1 }
  0xbf   :  { %v50_v15 = vadd.f32 %v49_v14, %v48_v13 }
  0xc1   :  { %143 = vpush %v50_v15 }
  0xd5   :  { %v111_v16 = vpop.xlane.xlu0 %110 }
  0xd6   :  { %v112_v17 = vrot.slane %v111_v16, 4 }
  0xd8   :  { %v113_v18 = vadd.f32 %v112_v17, %v111_v16 }
  0xda   :  { %v114_v19 = vrot.slane %v113_v18, 2 }
  0xdc   :  { %v115_v20 = vadd.f32 %v114_v19, %v113_v18 }
  0xde   :  { %v116_v21 = vrot.slane %v115_v20, 1 }
  0xe0   :  { %v117_v22 = vadd.f32 %v116_v21, %v115_v20 }
  0xe2   :  { %147 = vpush %v117_v22 }
  0xf2   :  { %s144_s1 = spop %143 }
  0xf3   :  { %v126_v24 = vstv %s144_s1 }
 0x113   :  { %s148_s16 = spop %147 }
 0x114   :  { %v124_v23 = vstv %s148_s16 }
 0x115   :  { %v125_v25 = vsel %vm123_vm11, %v124_v23, 0.0 }
 0x116   :  { %v127_v26 = vsel %vm121_vm12, %v126_v24, %v125_v25 }
 0x117   :  { %128 = vst [vmem:[#allocation2] sm:$0xff] %v127_v26 }
 0x118   :  { %171 = shalt.err (!%p168_p4)
}
 0x119   :  { %s172_s20 = scalar_lea.hbm %s246_s2, 128 }
 0x11a   :  { %p173_p5 = scmp.ne.s32.totalorder %s246_s2, %s172_s20  ;;  %p176_p6 = scmp.lt.u32.totalorder %s172_s20, %s246_s2 }
 0x11c   :  { %p178_p7 = pnand %p176_p6, %p173_p5 }
 0x11e   :  { %181 = shalt.err (!%p178_p7)
}
 0x11f   :  { %138 = dma.vmem_to_hbm [thread:$0]  %s136_s15, 128, %s246_s2, [#allocation3]  }
 0x120   :  { %182 = dma.done.wait [#allocation3], 128  }
 0x121   :  { %183 = vsyncadd [#allocation3], 4294967168 }
 0x122   :  { %142 = vsyncpa [#allocation3], 1 }

</bundles_post_ra>
